<compile_context>
chip_gen: v6e
topology: v6e:2x2x1
jax: 0.10.0
libtpu: 0.0.40
codegen_flags: <defaults>
</compile_context>

<pallas_src>
import jax
import jax.numpy as jnp
from jax.experimental import pallas as pl
from jax.experimental.pallas import tpu as pltpu

IN_FEATURES = 3072   # 3 * 32 * 32
OUT_FEATURES = 10
N_PAD = 128          # lane-dense padded output width


def _linear_kernel(x_ref, wt_ref, b_ref, o_ref):
    # x_ref: (TB, 3072) f32, wt_ref: (3072, 128) bf16, b_ref: (1, 128) f32
    # o_ref: (TB, 128) f32
    x_bf16 = x_ref[...].astype(jnp.bfloat16)          # VPU cast (free: HBM-bound)
    acc = jnp.dot(x_bf16, wt_ref[...], preferred_element_type=jnp.float32)
    o_ref[...] = acc + b_ref[...]


def prepare_params(weight, bias):
    """One-time param prep: transposed, zero-padded to 128 lanes, bf16 weights."""
    wt = jnp.zeros((IN_FEATURES, N_PAD), jnp.bfloat16)
    wt = wt.at[:, :OUT_FEATURES].set(weight.T.astype(jnp.bfloat16))
    b2d = jnp.zeros((1, N_PAD), jnp.float32)
    b2d = b2d.at[:, :OUT_FEATURES].set(bias.astype(jnp.float32))
    return wt, b2d


def lazynet_forward(x, wt, b2d, *, tb=1024):
    """x: (B, 3, 32, 32) f32; wt/b2d from prepare_params(). Returns (B, 10) f32."""
    B = x.shape[0]
    x_flat = x.reshape(B, IN_FEATURES)   # glue: same as torch .view(-1, 3072)

    # Batch tile: TB for large B; otherwise ~B/2 (>=2 grid steps keeps both
    # v7x TensorCores busy), rounded to a multiple of 8 for (8,128) alignment.
    if B >= 2 * tb:
        TB = tb
    else:
        TB = max(8, (((B + 1) // 2 + 7) // 8) * 8)
    grid = (pl.cdiv(B, TB),)

    out = pl.pallas_call(
        _linear_kernel,
        out_shape=jax.ShapeDtypeStruct((B, N_PAD), jnp.float32),
        grid_spec=pltpu.PrefetchScalarGridSpec(
            num_scalar_prefetch=0,
            grid=grid,
            in_specs=[
                pl.BlockSpec((TB, IN_FEATURES), lambda i: (i, 0)),      # stream f32 x tiles
                pl.BlockSpec((IN_FEATURES, N_PAD), lambda i: (0, 0)),   # resident bf16 weights
                pl.BlockSpec((1, N_PAD), lambda i: (0, 0)),             # resident bias
            ],
            out_specs=pl.BlockSpec((TB, N_PAD), lambda i: (i, 0)),
        ),
        compiler_params=pltpu.CompilerParams(
            dimension_semantics=("parallel",),
            vmem_limit_bytes=48 * 1024 * 1024,   # covers 2x(1024,3072) f32 + weights + out
        ),
    )(x_flat, wt, b2d)

    return out[:, :OUT_FEATURES]


def init_params(key):
    # Deterministic init mimicking nn.Linear default: U(-1/sqrt(fan_in), 1/sqrt(fan_in))
    k_w, k_b = jax.random.split(key)
    bound = 1.0 / jnp.sqrt(float(IN_FEATURES))
    weight = jax.random.uniform(k_w, (OUT_FEATURES, IN_FEATURES), jnp.float32, -bound, bound)
    bias = jax.random.uniform(k_b, (OUT_FEATURES,), jnp.float32, -bound, bound)
    return weight, bias


# TODO(synk): BaseModel's logging / criterion / optimizer are training-time
# infrastructure with no forward-pass equivalent; only forward() is implemented.

if __name__ == "__main__":
    key = jax.random.PRNGKey(0)
    k_x, k_p = jax.random.split(key)
    B = 2
    x = jax.random.normal(k_x, (B, 3, 32, 32), jnp.float32)  # NCHW, 3*32*32 = 3072
    weight, bias = init_params(k_p)
    wt, b2d = prepare_params(weight, bias)

    out = lazynet_forward(x, wt, b2d)
    out = jax.block_until_ready(out)
    assert out.shape == (B, OUT_FEATURES)

    # Reference 1: bf16-consistent (same quantization the kernel applies).
    x_flat = x.reshape(B, IN_FEATURES)
    ref_bf16 = (x_flat.astype(jnp.bfloat16).astype(jnp.float32)
                @ weight.astype(jnp.bfloat16).astype(jnp.float32).T) + bias
    assert jnp.allclose(out, ref_bf16, atol=1e-2, rtol=1e-2)

    # Reference 2: full-f32 PyTorch-equivalent forward (looser tolerance for bf16 matmul).
    ref_f32 = x_flat @ weight.T + bias
    assert jnp.allclose(out, ref_f32, atol=5e-2, rtol=5e-2)

    print("KERNEL_OK")
</pallas_src>

<mosaic_0001>
module attributes {stable_mosaic.version = 11 : i64} {
  func.func @_linear_kernel(%arg0: i32, %arg1: memref<8x3072xf32, #tpu.memory_space<vmem>>, %arg2: memref<3072x128xbf16, #tpu.memory_space<vmem>>, %arg3: memref<1x128xf32, #tpu.memory_space<vmem>>, %arg4: memref<8x128xf32, #tpu.memory_space<vmem>>) attributes {dimension_semantics = [#tpu.dimension_semantics<parallel>], iteration_bounds = array<i64: 1>, scalar_prefetch = 0 : i64, scratch_operands = 0 : i64, tpu.core_type = #tpu.core_type<tc>, window_params = [{transform_indices = @transform_0, window_bounds = array<i64: 8, 3072>}, {pipeline_mode = #tpu.pipeline_mode<synchronous>, transform_indices = @transform_1, window_bounds = array<i64: 3072, 128>}, {pipeline_mode = #tpu.pipeline_mode<synchronous>, transform_indices = @transform_2, window_bounds = array<i64: 1, 128>}, {transform_indices = @transform_3, window_bounds = array<i64: 8, 128>}]} {
    %c0 = arith.constant 0 : index
    %c0_0 = arith.constant 0 : index
    %0 = vector.load %arg1[%c0, %c0_0] : memref<8x3072xf32, #tpu.memory_space<vmem>>, vector<8x3072xf32>
    %1 = arith.truncf %0 : vector<8x3072xf32> to vector<8x3072xbf16>
    %c0_1 = arith.constant 0 : index
    %c0_2 = arith.constant 0 : index
    %2 = vector.load %arg2[%c0_1, %c0_2] : memref<3072x128xbf16, #tpu.memory_space<vmem>>, vector<3072x128xbf16>
    %cst = arith.constant dense<0.000000e+00> : vector<8x128xf32>
    %3 = tpu.matmul %1, %2, %cst {dimension_numbers = #tpu.dot_dimension_numbers<[1], [0], [0], [1], [0, 0, 1, 1], [], []>} : vector<8x3072xbf16>, vector<3072x128xbf16>, vector<8x128xf32> -> vector<8x128xf32>
    %c0_3 = arith.constant 0 : index
    %c0_4 = arith.constant 0 : index
    %4 = vector.load %arg3[%c0_3, %c0_4] : memref<1x128xf32, #tpu.memory_space<vmem>>, vector<1x128xf32>
    %5 = vector.broadcast %4 : vector<1x128xf32> to vector<8x128xf32>
    %6 = arith.addf %3, %5 : vector<8x128xf32>
    %c0_5 = arith.constant 0 : index
    %c0_6 = arith.constant 0 : index
    %7 = vector.load %arg4[%c0_5, %c0_6] : memref<8x128xf32, #tpu.memory_space<vmem>>, vector<8x128xf32>
    tpu.vector_store %arg4[%c0_5, %c0_6], %6 {strides = array<i32>} : memref<8x128xf32, #tpu.memory_space<vmem>>, vector<8x128xf32>,
    return
  }
  func.func @transform_0(%arg0: i32) -> (i32, i32) {
    %c0_i32 = arith.constant 0 : i32
    %c0_i32_0 = arith.constant 0 : i32
    return %arg0, %c0_i32 : i32, i32
  }
  func.func @transform_1(%arg0: i32) -> (i32, i32) {
    %c0_i32 = arith.constant 0 : i32
    %c0_i32_0 = arith.constant 0 : i32
    %c0_i32_1 = arith.constant 0 : i32
    return %c0_i32, %c0_i32_0 : i32, i32
  }
  func.func @transform_2(%arg0: i32) -> (i32, i32) {
    %c0_i32 = arith.constant 0 : i32
    %c0_i32_0 = arith.constant 0 : i32
    %c0_i32_1 = arith.constant 0 : i32
    return %c0_i32, %c0_i32_0 : i32, i32
  }
  func.func @transform_3(%arg0: i32) -> (i32, i32) {
    %c0_i32 = arith.constant 0 : i32
    %c0_i32_0 = arith.constant 0 : i32
    return %arg0, %c0_i32 : i32, i32
  }
}

</mosaic_0001>

<bundles_post_ra>
// kernel: tpu_custom_call.1
= control target key start
LH: loop header
LB: loop body
LE: loop exit
PB: predicated region body
PF: predicated region fallthrough
CT: control target
= control target key end

     0   :  { %8 = vsyncpa [#allocation3], 0  ;;  %s3227_s0 = inlined_call_operand.hbm [shape: f32[2,3072], index: 0, kind: input, shape index: {}]   ;;  %s3228_s1 = inlined_call_operand.hbm [shape: bf16[3072,128], index: 1, kind: input, shape index: {}]   ;;  %s3229_s2 = inlined_call_operand.vmem [shape: f32[1,128], index: 2, kind: input, shape index: {}]   ;;  %s3230_s3 = inlined_call_operand.hbm [shape: f32[2,128], index: 3, kind: output, shape index: {}]  }
   0x1   :  { %9 = vsyncpa [#allocation6], 0 }
   0x2   :  { %10 = vsyncpa [#allocation4], 0 }
   0x3   :  { %15 = vsyncadd [#allocation3], 2304  ;;  %s3159_s12 = smov [#allocation2]  }
   0x4   :  { %s16_s13 = sshll.u32 %s3159_s12, 4  ;;  %s17_s13 = int_to_ptr.vmem [resolvable:$true] %s16_s13 }
   0x5   :  { %s3101_s14 = scalar_lea.vmem %s17_s13, 768  ;;  %s3105_s15 = scalar_lea.vmem %s17_s13, 3072 }
   0x6   :  { %p3102_p0 = scmp.ne.s32.totalorder %s17_s13, %s3101_s14  ;;  %p3106_p1 = scmp.lt.s32.totalorder %s17_s13, %s17_s13 }
   0x7   :  { %p3107_p2 = scmp.lt.s32.totalorder %s3105_s15, %s3101_s14 }
   0x9   :  { %p3108_p3 = por %p3107_p2, %p3106_p1 }
   0xb   :  { %p3109_p4 = pnand %p3108_p3, %p3102_p0 }
   0xd   :  { %3112 = shalt.err (!%p3109_p4)
}
   0xe   :  { %s3160_s16 = smov 768   ;;  %s3161_s17 = smov 48  }
   0xf   :  { %22 = dma.hbm_to_vmem [thread:$0]  %s3227_s0, 768, %s17_s13, [#allocation3], %s3160_s16, %s3160_s16, %s3161_s17  }
  0x10   :  { %s3162_s20 = smov [#allocation5]  }
  0x11   :  { %s28_s21 = sshll.u32 %s3162_s20, 4  ;;  %s29_s21 = int_to_ptr.vmem [resolvable:$true] %s28_s21 }
  0x12   :  { %s3121_s22 = scalar_lea.vmem %s29_s21, 24576  ;;  %p3126_p6 = scmp.lt.s32.totalorder %s29_s21, %s29_s21 }
  0x13   :  { %p3122_p5 = scmp.ne.s32.totalorder %s29_s21, %s3121_s22  ;;  %p3127_p7 = scmp.lt.s32.totalorder %s3121_s22, %s3121_s22 }
  0x15   :  { %p3128_p8 = por %p3127_p7, %p3126_p6 }
  0x17   :  { %p3129_p9 = pnand %p3128_p8, %p3122_p5 }
  0x19   :  { %3132 = shalt.err (!%p3129_p9)
}
  0x1a   :  { %s3163_s23 = smov 64   ;;  %s3164_s24 = smov 4  }
  0x1b   :  { %34 = dma.hbm_to_vmem [thread:$0]  %s3228_s1, 24576, %s29_s21, [#allocation6], %s3163_s23, %s3163_s23, %s3164_s24  }
  0x1c   :  { %3153 = dma.done.wait [#allocation3], 3072  }
  0x1d   :  { %3154 = vsyncadd [#allocation3], 4294964224 }
  0x1e   :  { %3155 = dma.done.wait [#allocation6], 24576  }
  0x1f   :  { %3156 = vsyncadd [#allocation6], 4294942720  ;;  %v2865_v0 = vld [vmem:[#allocation5 + $0x78] sm:$0xff]   ;;  %v2869_v4 = vld [vmem:[#allocation5 + $0x70] sm:$0xff]   ;;  %v3165_v24 = vmov 1983009808   ;;  %v99_v26 = vlaneseq }
  0x20   :  { %v2866_v1 = vld [vmem:[#allocation5 + $0xf8] sm:$0xff]   ;;  %2591 = vmatprep.subr.bf16.mxu0 %v2865_v0  ;;  %v2870_v5 = vld [vmem:[#allocation5 + $0xf0] sm:$0xff]   ;;  %v2873_v8 = vld [vmem:[#allocation5 + $0x68] sm:$0xff]   ;;  %v97_v25 = vunpack.c.l.s4 %v3165_v24 }
  0x21   :  { %v2867_v2 = vld [vmem:[#allocation5 + $0x38] sm:$0xff]   ;;  %2613 = vmatprep.subr.bf16.mxu1 %v2866_v1  ;;  %v2871_v6 = vld [vmem:[#allocation5 + $0x30] sm:$0xff]   ;;  %v2874_v9 = vld [vmem:[#allocation5 + $0xe8] sm:$0xff]   ;;  %v100_v32 = vshrl.u32 %v99_v26, 7 }
  0x22   :  { %v2868_v3 = vld [vmem:[#allocation5 + $0xb8] sm:$0xff]   ;;  %2592 = vmatpush3.bf16.msra.mxu0 %v2867_v2  ;;  %v2872_v7 = vld [vmem:[#allocation5 + $0xb0] sm:$0xff]   ;;  %v2875_v10 = vld [vmem:[#allocation5 + $0x28] sm:$0xff]   ;;  %v98_v31 = vunpack.c.0.s8 %v97_v25 }
  0x23   :  { %2614 = vmatpush3.bf16.msra.mxu1 %v2868_v3  ;;  %2593 = vmatprep.subr.bf16.mxu0 %v2869_v4  ;;  %v2876_v11 = vld [vmem:[#allocation5 + $0xa8] sm:$0xff]   ;;  %v2877_v12 = vld [vmem:[#allocation5 + $0x60] sm:$0xff]   ;;  %v2881_v16 = vld [vmem:[#allocation5 + $0x58] sm:$0xff]  }
  0x24   :  { %2615 = vmatprep.subr.bf16.mxu1 %v2870_v5  ;;  %v2878_v13 = vld [vmem:[#allocation5 + $0xe0] sm:$0xff]   ;;  %v2882_v17 = vld [vmem:[#allocation5 + $0xd8] sm:$0xff]   ;;  %v2885_v20 = vld [vmem:[#allocation5 + $0x50] sm:$0xff]   ;;  %v3195_v37 = vsub.s32 %v98_v31, %v100_v32 }
  0x25   :  { %v2879_v14 = vld [vmem:[#allocation5 + $0x20] sm:$0xff]   ;;  %v2883_v18 = vld [vmem:[#allocation5 + $0x18] sm:$0xff]   ;;  %v2886_v21 = vld [vmem:[#allocation5 + $0xd0] sm:$0xff]  }
  0x26   :  { %2594 = vmatpush3.bf16.msra.mxu0 %v2871_v6  ;;  %v2880_v15 = vld [vmem:[#allocation5 + $0xa0] sm:$0xff]   ;;  %v2884_v19 = vld [vmem:[#allocation5 + $0x98] sm:$0xff]   ;;  %v2887_v22 = vld [vmem:[#allocation5 + $0x10] sm:$0xff]  }
  0x27   :  { %2616 = vmatpush3.bf16.msra.mxu1 %v2872_v7  ;;  %2595 = vmatprep.subr.bf16.mxu0 %v2873_v8  ;;  %v2888_v23 = vld [vmem:[#allocation5 + $0x90] sm:$0xff]   ;;  %v2889_v27 = vld [vmem:[#allocation5 + $0x48] sm:$0xff]   ;;  %v2893_v33 = vld [vmem:[#allocation5 + $0x40] sm:$0xff]  }
  0x28   :  { %2617 = vmatprep.subr.bf16.mxu1 %v2874_v9  ;;  %v2890_v28 = vld [vmem:[#allocation5 + $0xc8] sm:$0xff]   ;;  %v2894_v34 = vld [vmem:[#allocation5 + $0xc0] sm:$0xff]   ;;  %v2903_v44 = vld [vmem:[#allocation5 + $0x178] sm:$0xff]  }
  0x29   :  { %v2891_v29 = vld [vmem:[#allocation5 + $0x8] sm:$0xff]   ;;  %v2895_v35 = vld [vmem:[#allocation5] sm:$0xff]   ;;  %v2904_v47 = vld [vmem:[#allocation5 + $0x1f8] sm:$0xff]  }
  0x2a   :  { %2596 = vmatpush3.bf16.msra.mxu0 %v2875_v10  ;;  %v2892_v30 = vld [vmem:[#allocation5 + $0x88] sm:$0xff]   ;;  %v2896_v36 = vld [vmem:[#allocation5 + $0x80] sm:$0xff]   ;;  %v2905_v50 = vld [vmem:[#allocation5 + $0x138] sm:$0xff]  }
  0x2b   :  { %2618 = vmatpush3.bf16.msra.mxu1 %v2876_v11  ;;  %2597 = vmatprep.subr.bf16.mxu0 %v2877_v12  ;;  %v2897_v38 = vld [vmem:[#allocation2] ss:$48 sps:$4 sm:$0xff]   ;;  %v2901_v40 = vld [vmem:[#allocation2 + $0x4] ss:$48 sps:$4 sm:$0xff]   ;;  %v2906_v53 = vld [vmem:[#allocation5 + $0x1b8] sm:$0xff]  }
  0x2c   :  { %2619 = vmatprep.subr.bf16.mxu1 %v2878_v13  ;;  %v2899_v39 = vld [vmem:[#allocation2 + $0x60] ss:$48 sps:$4 sm:$0xff]   ;;  %v2902_v41 = vld [vmem:[#allocation2 + $0x64] ss:$48 sps:$4 sm:$0xff]   ;;  %v102_v42 = vrot.slane %v2897_v38, %v3195_v37  ;;  %v109_v45 = vrot.slane %v2901_v40, %v3195_v37  ;;  %v2911_v62 = vld [vmem:[#allocation5 + $0x168] sm:$0xff]  }
  0x2d   :  { %v116_v43 = vrot.slane %v2899_v39, %v3195_v37  ;;  %v123_v46 = vrot.slane %v2902_v41, %v3195_v37  ;;  %v2907_v56 = vld [vmem:[#allocation5 + $0x170] sm:$0xff]   ;;  %v2912_v63 = vld [vmem:[#allocation5 + $0x1e8] sm:$0xff]   ;;  %v2915_v2 = vld [vmem:[#allocation5 + $0x160] sm:$0xff]  }
  0x2e   :  { %2598 = vmatpush3.bf16.msra.mxu0 %v2879_v14  ;;  %v2908_v59 = vld [vmem:[#allocation5 + $0x1f0] sm:$0xff]   ;;  %v2913_v0 = vld [vmem:[#allocation5 + $0x128] sm:$0xff]   ;;  %v2916_v3 = vld [vmem:[#allocation5 + $0x1e0] sm:$0xff]  }
  0x2f   :  { %2620 = vmatpush3.bf16.msra.mxu1 %v2880_v15  ;;  %2599 = vmatprep.subr.bf16.mxu0 %v2881_v16  ;;  %v125_v48 = vcombine.high %v102_v42, %v116_v43  ;;  %v124_v49 = vcombine.low %v102_v42, %v116_v43  ;;  %v127_v51 = vcombine.high %v109_v45, %v123_v46  ;;  %v2909_v60 = vld [vmem:[#allocation5 + $0x130] sm:$0xff]   ;;  %v2914_v1 = vld [vmem:[#allocation5 + $0x1a8] sm:$0xff]   ;;  %v2917_v4 = vld [vmem:[#allocation5 + $0x120] sm:$0xff]  }
  0x30   :  { %2621 = vmatprep.subr.bf16.mxu1 %v2882_v17  ;;  %v126_v52 = vcombine.low %v109_v45, %v123_v46  ;;  %v2910_v61 = vld [vmem:[#allocation5 + $0x1b0] sm:$0xff]   ;;  %v2918_v5 = vld [vmem:[#allocation5 + $0x1a0] sm:$0xff]   ;;  %v2919_v6 = vld [vmem:[#allocation5 + $0x158] sm:$0xff]  }
  0x31   :  { %v333_v54 = vpack.c.bf16 %v125_v48, %v125_v48  ;;  %v332_v55 = vpack.c.bf16 %v124_v49, %v124_v49  ;;  %v335_v57 = vpack.c.bf16 %v127_v51, %v127_v51  ;;  %v2920_v7 = vld [vmem:[#allocation5 + $0x1d8] sm:$0xff]   ;;  %v2923_v10 = vld [vmem:[#allocation5 + $0x150] sm:$0xff]   ;;  %v2927_v14 = vld [vmem:[#allocation5 + $0x148] sm:$0xff]  }
  0x32   :  { %2600 = vmatpush3.bf16.msra.mxu0 %v2883_v18  ;;  %v334_v58 = vpack.c.bf16 %v126_v52, %v126_v52  ;;  %v2921_v8 = vld [vmem:[#allocation5 + $0x118] sm:$0xff]   ;;  %v2924_v11 = vld [vmem:[#allocation5 + $0x1d0] sm:$0xff]   ;;  %v2928_v15 = vld [vmem:[#allocation5 + $0x1c8] sm:$0xff]  }
  0x33   :  { %2622 = vmatpush3.bf16.msra.mxu1 %v2884_v19  ;;  %2601 = vmatprep.subr.bf16.mxu0 %v2885_v20  ;;  %v2922_v9 = vld [vmem:[#allocation5 + $0x198] sm:$0xff]   ;;  %v2925_v12 = vld [vmem:[#allocation5 + $0x110] sm:$0xff]   ;;  %v2929_v16 = vld [vmem:[#allocation5 + $0x108] sm:$0xff]  }
  0x34   :  { %2623 = vmatprep.subr.bf16.mxu1 %v2886_v21  ;;  %1931 = vmatprep.mubr.bf16.mxu0 %v333_v54  ;;  %v2926_v13 = vld [vmem:[#allocation5 + $0x190] sm:$0xff]   ;;  %v2930_v17 = vld [vmem:[#allocation5 + $0x188] sm:$0xff]   ;;  %v2931_v18 = vld [vmem:[#allocation5 + $0x140] sm:$0xff]  }
  0x35   :  { %1971 = vmatprep.mubr.bf16.mxu1 %v335_v57  ;;  %v2932_v19 = vld [vmem:[#allocation5 + $0x1c0] sm:$0xff]   ;;  %v2939_v24 = vld [vmem:[#allocation2 + $0xc] ss:$48 sps:$4 sm:$0xff]   ;;  %v2945_v41 = vld [vmem:[#allocation5 + $0x270] sm:$0xff]  }
  0x36   :  { %2602 = vmatpush3.bf16.msra.mxu0 %v2887_v22  ;;  %v2933_v20 = vld [vmem:[#allocation5 + $0x100] sm:$0xff]   ;;  %v2935_v22 = vld [vmem:[#allocation2 + $0x8] ss:$48 sps:$4 sm:$0xff]   ;;  %v2940_v25 = vld [vmem:[#allocation2 + $0x6c] ss:$48 sps:$4 sm:$0xff]  }
  0x37   :  { %2624 = vmatpush3.bf16.msra.mxu1 %v2888_v23  ;;  %2603 = vmatprep.subr.bf16.mxu0 %v2889_v27  ;;  %v2934_v21 = vld [vmem:[#allocation5 + $0x180] sm:$0xff]   ;;  %v2937_v23 = vld [vmem:[#allocation2 + $0x68] ss:$48 sps:$4 sm:$0xff]   ;;  %v138_v26 = vrot.slane %v2935_v22, %v3195_v37  ;;  %v2947_v45 = vld [vmem:[#allocation5 + $0x230] sm:$0xff]  }
  0x38   :  { %2625 = vmatprep.subr.bf16.mxu1 %v2890_v28  ;;  %v152_v27 = vrot.slane %v2937_v23, %v3195_v37  ;;  %v145_v28 = vrot.slane %v2939_v24, %v3195_v37  ;;  %v2942_v31 = vld [vmem:[#allocation5 + $0x2f8] sm:$0xff]   ;;  %v2948_v46 = vld [vmem:[#allocation5 + $0x2b0] sm:$0xff]   ;;  %v2950_v48 = vld [vmem:[#allocation5 + $0x2e8] sm:$0xff]  }
  0x39   :  { %v2944_v38 = vld [vmem:[#allocation5 + $0x2b8] sm:$0xff]   ;;  %v2951_v49 = vld [vmem:[#allocation5 + $0x228] sm:$0xff]   ;;  %v2953_v51 = vld [vmem:[#allocation5 + $0x260] sm:$0xff]  }
  0x3a   :  { %2604 = vmatpush3.bf16.msra.mxu0 %v2891_v29  ;;  %v2941_v29 = vld [vmem:[#allocation5 + $0x278] sm:$0xff]   ;;  %v161_v32 = vcombine.high %v138_v26, %v152_v27  ;;  %v2954_v52 = vld [vmem:[#allocation5 + $0x2e0] sm:$0xff]  }
  0x3b   :  { %2626 = vmatpush3.bf16.msra.mxu1 %v2892_v30  ;;  %2605 = vmatprep.subr.bf16.mxu0 %v2893_v33  ;;  %v159_v30 = vrot.slane %v2940_v25, %v3195_v37  ;;  %v160_v33 = vcombine.low %v138_v26, %v152_v27  ;;  %v2956_v54 = vld [vmem:[#allocation5 + $0x2a0] sm:$0xff]   ;;  %v2959_v57 = vld [vmem:[#allocation5 + $0x218] sm:$0xff]   ;;  %v2983_v27 = vld [vmem:[#allocation5 + $0x370] sm:$0xff]  }
  0x3c   :  { %2627 = vmatprep.subr.bf16.mxu1 %v2894_v34  ;;  %v2943_v34 = vld [vmem:[#allocation5 + $0x238] sm:$0xff]   ;;  %v337_v39 = vpack.c.bf16 %v161_v32, %v161_v32  ;;  %v2988_v32 = vld [vmem:[#allocation5 + $0x3e8] sm:$0xff]  }
  0x3d   :  { %v336_v40 = vpack.c.bf16 %v160_v33, %v160_v33  ;;  %v2982_v22 = vld [vmem:[#allocation5 + $0x3b8] sm:$0xff]   ;;  %v2989_v33 = vld [vmem:[#allocation5 + $0x328] sm:$0xff]  }
  0x3e   :  { %2606 = vmatpush3.bf16.msra.mxu0 %v2895_v35  ;;  %v163_v35 = vcombine.high %v145_v28, %v159_v30 }
  0x3f   :  { %2628 = vmatpush3.bf16.msra.mxu1 %v2896_v36  ;;  %2635 = vmatprep.subr.bf16.mxu0 %v2903_v44  ;;  %v162_v36 = vcombine.low %v145_v28, %v159_v30  ;;  %v2946_v44 = vld [vmem:[#allocation5 + $0x2f0] sm:$0xff]  }
  0x40   :  { %2657 = vmatprep.subr.bf16.mxu1 %v2904_v47  ;;  %v339_v42 = vpack.c.bf16 %v163_v35, %v163_v35  ;;  %v2949_v47 = vld [vmem:[#allocation5 + $0x268] sm:$0xff]   ;;  %v2984_v28 = vld [vmem:[#allocation5 + $0x3f0] sm:$0xff]   ;;  %v2991_v35 = vld [vmem:[#allocation5 + $0x360] sm:$0xff]  }
  0x41   :  { %1932 = vmatmul.mubr.bf16.vlgmr.msra.gmra.mxu0 %v332_v55  ;;  %v338_v43 = vpack.c.bf16 %v162_v36, %v162_v36  ;;  %v2957_v55 = vld [vmem:[#allocation5 + $0x258] sm:$0xff]   ;;  %v2986_v30 = vld [vmem:[#allocation5 + $0x3b0] sm:$0xff]   ;;  %v2992_v36 = vld [vmem:[#allocation5 + $0x3e0] sm:$0xff]  }
  0x42   :  { %1972 = vmatmul.mubr.bf16.vlgmr.msra.gmra.mxu1 %v334_v58  ;;  %2636 = vmatpush3.bf16.msra.mxu0 %v2905_v50  ;;  %v2952_v50 = vld [vmem:[#allocation5 + $0x2a8] sm:$0xff]   ;;  %v2960_v58 = vld [vmem:[#allocation5 + $0x298] sm:$0xff]  }
  0x43   :  { %2658 = vmatpush3.bf16.msra.mxu1 %v2906_v53  ;;  %2637 = vmatprep.subr.bf16.mxu0 %v2907_v56  ;;  %v2955_v53 = vld [vmem:[#allocation5 + $0x220] sm:$0xff]   ;;  %v2958_v56 = vld [vmem:[#allocation5 + $0x2d8] sm:$0xff]  }
  0x44   :  { %2659 = vmatprep.subr.bf16.mxu1 %v2908_v59  ;;  %2011 = vmatprep.mubr.bf16.mxu0 %v337_v39  ;;  %v2961_v59 = vld [vmem:[#allocation5 + $0x250] sm:$0xff]   ;;  %v2994_v39 = vld [vmem:[#allocation5 + $0x3a0] sm:$0xff]  }
  0x45   :  { %2051 = vmatprep.mubr.bf16.mxu1 %v339_v42  ;;  %v2997_v42 = vld [vmem:[#allocation5 + $0x318] sm:$0xff]  }
  0x46   :  { %2638 = vmatpush3.bf16.msra.mxu0 %v2909_v60  ;;  %v2962_v60 = vld [vmem:[#allocation5 + $0x2d0] sm:$0xff]  }
  0x47   :  { %2660 = vmatpush3.bf16.msra.mxu1 %v2910_v61  ;;  %2639 = vmatprep.subr.bf16.mxu0 %v2911_v62  ;;  %v2963_v61 = vld [vmem:[#allocation5 + $0x210] sm:$0xff]  }
  0x48   :  { %2661 = vmatprep.subr.bf16.mxu1 %v2912_v63  ;;  %v2964_v62 = vld [vmem:[#allocation5 + $0x290] sm:$0xff]   ;;  %v2965_v63 = vld [vmem:[#allocation5 + $0x248] sm:$0xff]  }
  0x4a   :  { %2640 = vmatpush3.bf16.msra.mxu0 %v2913_v0  ;;  %v2966_v0 = vld [vmem:[#allocation5 + $0x2c8] sm:$0xff]  }
  0x4b   :  { %2662 = vmatpush3.bf16.msra.mxu1 %v2914_v1  ;;  %2641 = vmatprep.subr.bf16.mxu0 %v2915_v2  ;;  %v2967_v1 = vld [vmem:[#allocation5 + $0x208] sm:$0xff]  }
  0x4c   :  { %2663 = vmatprep.subr.bf16.mxu1 %v2916_v3  ;;  %v2968_v2 = vld [vmem:[#allocation5 + $0x288] sm:$0xff]   ;;  %v2969_v3 = vld [vmem:[#allocation5 + $0x240] sm:$0xff]  }
  0x4e   :  { %2642 = vmatpush3.bf16.msra.mxu0 %v2917_v4  ;;  %v2970_v4 = vld [vmem:[#allocation5 + $0x2c0] sm:$0xff]  }
  0x4f   :  { %2664 = vmatpush3.bf16.msra.mxu1 %v2918_v5  ;;  %2643 = vmatprep.subr.bf16.mxu0 %v2919_v6  ;;  %v2971_v5 = vld [vmem:[#allocation5 + $0x200] sm:$0xff]  }
  0x50   :  { %2665 = vmatprep.subr.bf16.mxu1 %v2920_v7  ;;  %v2972_v6 = vld [vmem:[#allocation5 + $0x280] sm:$0xff]  }
  0x51   :  { %v2973_v7 = vld [vmem:[#allocation2 + $0x10] ss:$48 sps:$4 sm:$0xff]  }
  0x52   :  { %2644 = vmatpush3.bf16.msra.mxu0 %v2921_v8  ;;  %v2975_v8 = vld [vmem:[#allocation2 + $0x70] ss:$48 sps:$4 sm:$0xff]  }
  0x53   :  { %2666 = vmatpush3.bf16.msra.mxu1 %v2922_v9  ;;  %2645 = vmatprep.subr.bf16.mxu0 %v2923_v10  ;;  %v2977_v9 = vld [vmem:[#allocation2 + $0x14] ss:$48 sps:$4 sm:$0xff]  }
  0x54   :  { %2667 = vmatprep.subr.bf16.mxu1 %v2924_v11  ;;  %v2978_v10 = vld [vmem:[#allocation2 + $0x74] ss:$48 sps:$4 sm:$0xff]   ;;  %v174_v11 = vrot.slane %v2973_v7, %v3195_v37  ;;  %v3020_v7 = vld [vmem:[#allocation5 + $0x4b8] sm:$0xff]  }
  0x56   :  { %2646 = vmatpush3.bf16.msra.mxu0 %v2925_v12  ;;  %v2979_v12 = vld [vmem:[#allocation5 + $0x378] sm:$0xff]  }
  0x57   :  { %2668 = vmatpush3.bf16.msra.mxu1 %v2926_v13  ;;  %2647 = vmatprep.subr.bf16.mxu0 %v2927_v14  ;;  %v188_v13 = vrot.slane %v2975_v8, %v3195_v37  ;;  %v181_v14 = vrot.slane %v2977_v9, %v3195_v37 }
  0x58   :  { %2669 = vmatprep.subr.bf16.mxu1 %v2928_v15  ;;  %v195_v15 = vrot.slane %v2978_v10, %v3195_v37  ;;  %v3021_v10 = vld [vmem:[#allocation5 + $0x470] sm:$0xff]  }
  0x5a   :  { %2648 = vmatpush3.bf16.msra.mxu0 %v2929_v16  ;;  %v2980_v16 = vld [vmem:[#allocation5 + $0x3f8] sm:$0xff]  }
  0x5b   :  { %2670 = vmatpush3.bf16.msra.mxu1 %v2930_v17  ;;  %2649 = vmatprep.subr.bf16.mxu0 %v2931_v18  ;;  %v197_v17 = vcombine.high %v174_v11, %v188_v13  ;;  %v199_v18 = vcombine.high %v181_v14, %v195_v15 }
  0x5c   :  { %2671 = vmatprep.subr.bf16.mxu1 %v2932_v19  ;;  %v196_v19 = vcombine.low %v174_v11, %v188_v13  ;;  %v3022_v13 = vld [vmem:[#allocation5 + $0x4f0] sm:$0xff]  }
  0x5d   :  { %v341_v23 = vpack.c.bf16 %v197_v17, %v197_v17  ;;  %v343_v24 = vpack.c.bf16 %v199_v18, %v199_v18  ;;  %v3026_v17 = vld [vmem:[#allocation5 + $0x4e8] sm:$0xff]  }
  0x5e   :  { %2650 = vmatpush3.bf16.msra.mxu0 %v2933_v20  ;;  %v198_v20 = vcombine.low %v181_v14, %v195_v15  ;;  %v340_v25 = vpack.c.bf16 %v196_v19, %v196_v19  ;;  %v3023_v14 = vld [vmem:[#allocation5 + $0x430] sm:$0xff]   ;;  %v3027_v18 = vld [vmem:[#allocation5 + $0x428] sm:$0xff]  }
  0x5f   :  { %2672 = vmatpush3.bf16.msra.mxu1 %v2934_v21  ;;  %2679 = vmatprep.subr.bf16.mxu0 %v2941_v29  ;;  %v2981_v21 = vld [vmem:[#allocation5 + $0x338] sm:$0xff]   ;;  %v2985_v29 = vld [vmem:[#allocation5 + $0x330] sm:$0xff]   ;;  %v3028_v19 = vld [vmem:[#allocation5 + $0x4a8] sm:$0xff]  }
  0x60   :  { %2701 = vmatprep.subr.bf16.mxu1 %v2942_v31  ;;  %v342_v26 = vpack.c.bf16 %v198_v20, %v198_v20  ;;  %v2987_v31 = vld [vmem:[#allocation5 + $0x368] sm:$0xff]   ;;  %v3024_v15 = vld [vmem:[#allocation5 + $0x4b0] sm:$0xff]   ;;  %v3029_v20 = vld [vmem:[#allocation5 + $0x460] sm:$0xff]  }
  0x61   :  { %2012 = vmatmul.mubr.bf16.vlgmr.msra.gmra.mxu0 %v336_v40  ;;  %v2995_v40 = vld [vmem:[#allocation5 + $0x358] sm:$0xff]  }
  0x62   :  { %2052 = vmatmul.mubr.bf16.vlgmr.msra.gmra.mxu1 %v338_v43  ;;  %2680 = vmatpush3.bf16.msra.mxu0 %v2943_v34  ;;  %v2990_v34 = vld [vmem:[#allocation5 + $0x3a8] sm:$0xff]   ;;  %v2998_v43 = vld [vmem:[#allocation5 + $0x398] sm:$0xff]  }
  0x63   :  { %2702 = vmatpush3.bf16.msra.mxu1 %v2944_v38  ;;  %2681 = vmatprep.subr.bf16.mxu0 %v2945_v41  ;;  %v2993_v38 = vld [vmem:[#allocation5 + $0x320] sm:$0xff]   ;;  %v2996_v41 = vld [vmem:[#allocation5 + $0x3d8] sm:$0xff]  }
  0x64   :  { %2703 = vmatprep.subr.bf16.mxu1 %v2946_v44  ;;  %2091 = vmatprep.mubr.bf16.mxu0 %v341_v23  ;;  %v2999_v44 = vld [vmem:[#allocation5 + $0x350] sm:$0xff]   ;;  %v3032_v23 = vld [vmem:[#allocation5 + $0x4a0] sm:$0xff]  }
  0x65   :  { %2131 = vmatprep.mubr.bf16.mxu1 %v343_v24  ;;  %v3033_v24 = vld [vmem:[#allocation5 + $0x458] sm:$0xff]  }
  0x66   :  { %2682 = vmatpush3.bf16.msra.mxu0 %v2947_v45  ;;  %v3000_v45 = vld [vmem:[#allocation5 + $0x3d0] sm:$0xff]  }
  0x67   :  { %2704 = vmatpush3.bf16.msra.mxu1 %v2948_v46  ;;  %2683 = vmatprep.subr.bf16.mxu0 %v2949_v47  ;;  %v3001_v46 = vld [vmem:[#allocation5 + $0x310] sm:$0xff]  }
  0x68   :  { %2705 = vmatprep.subr.bf16.mxu1 %v2950_v48  ;;  %v3002_v47 = vld [vmem:[#allocation5 + $0x390] sm:$0xff]   ;;  %v3003_v48 = vld [vmem:[#allocation5 + $0x348] sm:$0xff]  }
  0x6a   :  { %2684 = vmatpush3.bf16.msra.mxu0 %v2951_v49  ;;  %v3004_v49 = vld [vmem:[#allocation5 + $0x3c8] sm:$0xff]  }
  0x6b   :  { %2706 = vmatpush3.bf16.msra.mxu1 %v2952_v50  ;;  %2685 = vmatprep.subr.bf16.mxu0 %v2953_v51  ;;  %v3005_v50 = vld [vmem:[#allocation5 + $0x308] sm:$0xff]  }
  0x6c   :  { %2707 = vmatprep.subr.bf16.mxu1 %v2954_v52  ;;  %v3006_v51 = vld [vmem:[#allocation5 + $0x388] sm:$0xff]   ;;  %v3007_v52 = vld [vmem:[#allocation5 + $0x340] sm:$0xff]  }
  0x6e   :  { %2686 = vmatpush3.bf16.msra.mxu0 %v2955_v53  ;;  %v3008_v53 = vld [vmem:[#allocation5 + $0x3c0] sm:$0xff]  }
  0x6f   :  { %2708 = vmatpush3.bf16.msra.mxu1 %v2956_v54  ;;  %2687 = vmatprep.subr.bf16.mxu0 %v2957_v55  ;;  %v3009_v54 = vld [vmem:[#allocation5 + $0x300] sm:$0xff]  }
  0x70   :  { %2709 = vmatprep.subr.bf16.mxu1 %v2958_v56  ;;  %v3010_v55 = vld [vmem:[#allocation5 + $0x380] sm:$0xff]   ;;  %v3011_v56 = vld [vmem:[#allocation2 + $0x18] ss:$48 sps:$4 sm:$0xff]  }
  0x72   :  { %2688 = vmatpush3.bf16.msra.mxu0 %v2959_v57  ;;  %v3013_v57 = vld [vmem:[#allocation2 + $0x78] ss:$48 sps:$4 sm:$0xff]  }
  0x73   :  { %2710 = vmatpush3.bf16.msra.mxu1 %v2960_v58  ;;  %2689 = vmatprep.subr.bf16.mxu0 %v2961_v59  ;;  %v3015_v58 = vld [vmem:[#allocation2 + $0x1c] ss:$48 sps:$4 sm:$0xff]  }
  0x74   :  { %2711 = vmatprep.subr.bf16.mxu1 %v2962_v60  ;;  %v3016_v59 = vld [vmem:[#allocation2 + $0x7c] ss:$48 sps:$4 sm:$0xff]   ;;  %v210_v60 = vrot.slane %v3011_v56, %v3195_v37 }
  0x75   :  { %v3058_v56 = vld [vmem:[#allocation5 + $0x5b8] sm:$0xff]  }
  0x76   :  { %2690 = vmatpush3.bf16.msra.mxu0 %v2963_v61  ;;  %v224_v61 = vrot.slane %v3013_v57, %v3195_v37 }
  0x77   :  { %2712 = vmatpush3.bf16.msra.mxu1 %v2964_v62  ;;  %2691 = vmatprep.subr.bf16.mxu0 %v2965_v63  ;;  %v3017_v62 = vld [vmem:[#allocation5 + $0x478] sm:$0xff]   ;;  %v217_v63 = vrot.slane %v3015_v58, %v3195_v37 }
  0x78   :  { %2713 = vmatprep.subr.bf16.mxu1 %v2966_v0  ;;  %v231_v0 = vrot.slane %v3016_v59, %v3195_v37  ;;  %v3059_v59 = vld [vmem:[#allocation5 + $0x570] sm:$0xff]  }
  0x7a   :  { %2692 = vmatpush3.bf16.msra.mxu0 %v2967_v1  ;;  %v3018_v1 = vld [vmem:[#allocation5 + $0x4f8] sm:$0xff]  }
  0x7b   :  { %2714 = vmatpush3.bf16.msra.mxu1 %v2968_v2  ;;  %2693 = vmatprep.subr.bf16.mxu0 %v2969_v3  ;;  %v233_v2 = vcombine.high %v210_v60, %v224_v61  ;;  %v232_v3 = vcombine.low %v210_v60, %v224_v61 }
  0x7c   :  { %2715 = vmatprep.subr.bf16.mxu1 %v2970_v4  ;;  %v3019_v4 = vld [vmem:[#allocation5 + $0x438] sm:$0xff]  }
  0x7d   :  { %v345_v8 = vpack.c.bf16 %v233_v2, %v233_v2  ;;  %v344_v9 = vpack.c.bf16 %v232_v3, %v232_v3  ;;  %v3064_v2 = vld [vmem:[#allocation5 + $0x5e8] sm:$0xff]  }
  0x7e   :  { %2694 = vmatpush3.bf16.msra.mxu0 %v2971_v5  ;;  %v235_v5 = vcombine.high %v217_v63, %v231_v0  ;;  %v3065_v3 = vld [vmem:[#allocation5 + $0x528] sm:$0xff]  }
  0x7f   :  { %2716 = vmatpush3.bf16.msra.mxu1 %v2972_v6  ;;  %2723 = vmatprep.subr.bf16.mxu0 %v2979_v12  ;;  %v234_v6 = vcombine.low %v217_v63, %v231_v0  ;;  %v3061_v63 = vld [vmem:[#allocation5 + $0x530] sm:$0xff]  }
  0x80   :  { %2745 = vmatprep.subr.bf16.mxu1 %v2980_v16  ;;  %v347_v11 = vpack.c.bf16 %v235_v5, %v235_v5  ;;  %v3025_v16 = vld [vmem:[#allocation5 + $0x468] sm:$0xff]   ;;  %v3062_v0 = vld [vmem:[#allocation5 + $0x5b0] sm:$0xff]   ;;  %v3067_v5 = vld [vmem:[#allocation5 + $0x560] sm:$0xff]  }
  0x81   :  { %2092 = vmatmul.mubr.bf16.vlgmr.msra.gmra.mxu0 %v340_v25  ;;  %v346_v12 = vpack.c.bf16 %v234_v6, %v234_v6  ;;  %v3034_v25 = vld [vmem:[#allocation5 + $0x4d8] sm:$0xff]   ;;  %v3068_v6 = vld [vmem:[#allocation5 + $0x5e0] sm:$0xff]  }
  0x82   :  { %2132 = vmatmul.mubr.bf16.vlgmr.msra.gmra.mxu1 %v342_v26  ;;  %2724 = vmatpush3.bf16.msra.mxu0 %v2981_v21  ;;  %v3030_v21 = vld [vmem:[#allocation5 + $0x4e0] sm:$0xff]   ;;  %v3035_v26 = vld [vmem:[#allocation5 + $0x418] sm:$0xff]  }
  0x83   :  { %2746 = vmatpush3.bf16.msra.mxu1 %v2982_v22  ;;  %2725 = vmatprep.subr.bf16.mxu0 %v2983_v27  ;;  %v3031_v22 = vld [vmem:[#allocation5 + $0x420] sm:$0xff]   ;;  %v3036_v27 = vld [vmem:[#allocation5 + $0x498] sm:$0xff]  }
  0x84   :  { %2747 = vmatprep.subr.bf16.mxu1 %v2984_v28  ;;  %2171 = vmatprep.mubr.bf16.mxu0 %v345_v8  ;;  %v3037_v28 = vld [vmem:[#allocation5 + $0x450] sm:$0xff]   ;;  %v3070_v8 = vld [vmem:[#allocation5 + $0x5a0] sm:$0xff]  }
  0x85   :  { %2211 = vmatprep.mubr.bf16.mxu1 %v347_v11  ;;  %v3073_v11 = vld [vmem:[#allocation5 + $0x518] sm:$0xff]  }
  0x86   :  { %2726 = vmatpush3.bf16.msra.mxu0 %v2985_v29  ;;  %v3038_v29 = vld [vmem:[#allocation5 + $0x4d0] sm:$0xff]  }
  0x87   :  { %2748 = vmatpush3.bf16.msra.mxu1 %v2986_v30  ;;  %2727 = vmatprep.subr.bf16.mxu0 %v2987_v31  ;;  %v3039_v30 = vld [vmem:[#allocation5 + $0x410] sm:$0xff]  }
  0x88   :  { %2749 = vmatprep.subr.bf16.mxu1 %v2988_v32  ;;  %v3040_v31 = vld [vmem:[#allocation5 + $0x490] sm:$0xff]   ;;  %v3041_v32 = vld [vmem:[#allocation5 + $0x448] sm:$0xff]  }
  0x8a   :  { %2728 = vmatpush3.bf16.msra.mxu0 %v2989_v33  ;;  %v3042_v33 = vld [vmem:[#allocation5 + $0x4c8] sm:$0xff]  }
  0x8b   :  { %2750 = vmatpush3.bf16.msra.mxu1 %v2990_v34  ;;  %2729 = vmatprep.subr.bf16.mxu0 %v2991_v35  ;;  %v3043_v34 = vld [vmem:[#allocation5 + $0x408] sm:$0xff]  }
  0x8c   :  { %2751 = vmatprep.subr.bf16.mxu1 %v2992_v36  ;;  %v3044_v35 = vld [vmem:[#allocation5 + $0x488] sm:$0xff]   ;;  %v3045_v36 = vld [vmem:[#allocation5 + $0x440] sm:$0xff]  }
  0x8e   :  { %2730 = vmatpush3.bf16.msra.mxu0 %v2993_v38  ;;  %v3046_v38 = vld [vmem:[#allocation5 + $0x4c0] sm:$0xff]  }
  0x8f   :  { %2752 = vmatpush3.bf16.msra.mxu1 %v2994_v39  ;;  %2731 = vmatprep.subr.bf16.mxu0 %v2995_v40  ;;  %v3047_v39 = vld [vmem:[#allocation5 + $0x400] sm:$0xff]  }
  0x90   :  { %2753 = vmatprep.subr.bf16.mxu1 %v2996_v41  ;;  %v3048_v40 = vld [vmem:[#allocation5 + $0x480] sm:$0xff]  }
  0x91   :  { %v3049_v41 = vld [vmem:[#allocation2 + $0x20] ss:$48 sps:$4 sm:$0xff]  }
  0x92   :  { %2732 = vmatpush3.bf16.msra.mxu0 %v2997_v42  ;;  %v3051_v42 = vld [vmem:[#allocation2 + $0x80] ss:$48 sps:$4 sm:$0xff]  }
  0x93   :  { %2754 = vmatpush3.bf16.msra.mxu1 %v2998_v43  ;;  %2733 = vmatprep.subr.bf16.mxu0 %v2999_v44  ;;  %v3053_v43 = vld [vmem:[#allocation2 + $0x24] ss:$48 sps:$4 sm:$0xff]  }
  0x94   :  { %2755 = vmatprep.subr.bf16.mxu1 %v3000_v45  ;;  %v3054_v44 = vld [vmem:[#allocation2 + $0x84] ss:$48 sps:$4 sm:$0xff]   ;;  %v246_v45 = vrot.slane %v3049_v41, %v3195_v37 }
  0x96   :  { %2734 = vmatpush3.bf16.msra.mxu0 %v3001_v46  ;;  %v260_v46 = vrot.slane %v3051_v42, %v3195_v37 }
  0x97   :  { %2756 = vmatpush3.bf16.msra.mxu1 %v3002_v47  ;;  %2735 = vmatprep.subr.bf16.mxu0 %v3003_v48  ;;  %v253_v47 = vrot.slane %v3053_v43, %v3195_v37  ;;  %v3055_v48 = vld [vmem:[#allocation5 + $0x578] sm:$0xff]  }
  0x98   :  { %2757 = vmatprep.subr.bf16.mxu1 %v3004_v49  ;;  %v267_v49 = vrot.slane %v3054_v44, %v3195_v37 }
  0x9a   :  { %2736 = vmatpush3.bf16.msra.mxu0 %v3005_v50  ;;  %v3056_v50 = vld [vmem:[#allocation5 + $0x5f8] sm:$0xff]  }
  0x9b   :  { %2758 = vmatpush3.bf16.msra.mxu1 %v3006_v51  ;;  %2737 = vmatprep.subr.bf16.mxu0 %v3007_v52  ;;  %v269_v51 = vcombine.high %v246_v45, %v260_v46  ;;  %v268_v52 = vcombine.low %v246_v45, %v260_v46 }
  0x9c   :  { %2759 = vmatprep.subr.bf16.mxu1 %v3008_v53  ;;  %v3057_v53 = vld [vmem:[#allocation5 + $0x538] sm:$0xff]  }
  0x9d   :  { %v349_v57 = vpack.c.bf16 %v269_v51, %v269_v51  ;;  %v348_v58 = vpack.c.bf16 %v268_v52, %v268_v52 }
  0x9e   :  { %2738 = vmatpush3.bf16.msra.mxu0 %v3009_v54  ;;  %v271_v54 = vcombine.high %v253_v47, %v267_v49 }
  0x9f   :  { %2760 = vmatpush3.bf16.msra.mxu1 %v3010_v55  ;;  %2767 = vmatprep.subr.bf16.mxu0 %v3017_v62  ;;  %v270_v55 = vcombine.low %v253_v47, %v267_v49  ;;  %v3060_v62 = vld [vmem:[#allocation5 + $0x5f0] sm:$0xff]  }
  0xa0   :  { %2789 = vmatprep.subr.bf16.mxu1 %v3018_v1  ;;  %v351_v60 = vpack.c.bf16 %v271_v54, %v271_v54  ;;  %v3063_v1 = vld [vmem:[#allocation5 + $0x568] sm:$0xff]  }
  0xa1   :  { %2172 = vmatmul.mubr.bf16.vlgmr.msra.gmra.mxu0 %v344_v9  ;;  %v350_v61 = vpack.c.bf16 %v270_v55, %v270_v55  ;;  %v3071_v9 = vld [vmem:[#allocation5 + $0x558] sm:$0xff]  }
  0xa2   :  { %2212 = vmatmul.mubr.bf16.vlgmr.msra.gmra.mxu1 %v346_v12  ;;  %2768 = vmatpush3.bf16.msra.mxu0 %v3019_v4  ;;  %v3066_v4 = vld [vmem:[#allocation5 + $0x5a8] sm:$0xff]   ;;  %v3074_v12 = vld [vmem:[#allocation5 + $0x598] sm:$0xff]  }
  0xa3   :  { %2790 = vmatpush3.bf16.msra.mxu1 %v3020_v7  ;;  %2769 = vmatprep.subr.bf16.mxu0 %v3021_v10  ;;  %v3069_v7 = vld [vmem:[#allocation5 + $0x520] sm:$0xff]   ;;  %v3072_v10 = vld [vmem:[#allocation5 + $0x5d8] sm:$0xff]  }
  0xa4   :  { %2791 = vmatprep.subr.bf16.mxu1 %v3022_v13  ;;  %2251 = vmatprep.mubr.bf16.mxu0 %v349_v57  ;;  %v3075_v13 = vld [vmem:[#allocation5 + $0x550] sm:$0xff]  }
  0xa5   :  { %2291 = vmatprep.mubr.bf16.mxu1 %v351_v60 }
  0xa6   :  { %2770 = vmatpush3.bf16.msra.mxu0 %v3023_v14  ;;  %v3076_v14 = vld [vmem:[#allocation5 + $0x5d0] sm:$0xff]  }
  0xa7   :  { %2792 = vmatpush3.bf16.msra.mxu1 %v3024_v15  ;;  %2771 = vmatprep.subr.bf16.mxu0 %v3025_v16  ;;  %v3077_v15 = vld [vmem:[#allocation5 + $0x510] sm:$0xff]  }
  0xa8   :  { %2793 = vmatprep.subr.bf16.mxu1 %v3026_v17  ;;  %v3078_v16 = vld [vmem:[#allocation5 + $0x590] sm:$0xff]   ;;  %v3079_v17 = vld [vmem:[#allocation5 + $0x548] sm:$0xff]  }
  0xaa   :  { %2772 = vmatpush3.bf16.msra.mxu0 %v3027_v18  ;;  %v3080_v18 = vld [vmem:[#allocation5 + $0x5c8] sm:$0xff]  }
  0xab   :  { %2794 = vmatpush3.bf16.msra.mxu1 %v3028_v19  ;;  %2773 = vmatprep.subr.bf16.mxu0 %v3029_v20  ;;  %v3081_v19 = vld [vmem:[#allocation5 + $0x508] sm:$0xff]  }
  0xac   :  { %2795 = vmatprep.subr.bf16.mxu1 %v3030_v21  ;;  %v3082_v20 = vld [vmem:[#allocation5 + $0x588] sm:$0xff]   ;;  %v3083_v21 = vld [vmem:[#allocation5 + $0x540] sm:$0xff]  }
  0xae   :  { %2774 = vmatpush3.bf16.msra.mxu0 %v3031_v22  ;;  %v3084_v22 = vld [vmem:[#allocation5 + $0x5c0] sm:$0xff]  }
  0xaf   :  { %2796 = vmatpush3.bf16.msra.mxu1 %v3032_v23  ;;  %2775 = vmatprep.subr.bf16.mxu0 %v3033_v24  ;;  %v3085_v23 = vld [vmem:[#allocation5 + $0x500] sm:$0xff]  }
  0xb0   :  { %2797 = vmatprep.subr.bf16.mxu1 %v3034_v25  ;;  %v3086_v24 = vld [vmem:[#allocation5 + $0x580] sm:$0xff]   ;;  %v3087_v25 = vld [vmem:[#allocation2 + $0x28] ss:$48 sps:$4 sm:$0xff]  }
  0xb2   :  { %2776 = vmatpush3.bf16.msra.mxu0 %v3035_v26  ;;  %v3089_v26 = vld [vmem:[#allocation2 + $0x88] ss:$48 sps:$4 sm:$0xff]  }
  0xb3   :  { %2798 = vmatpush3.bf16.msra.mxu1 %v3036_v27  ;;  %2777 = vmatprep.subr.bf16.mxu0 %v3037_v28  ;;  %v3091_v27 = vld [vmem:[#allocation2 + $0x2c] ss:$48 sps:$4 sm:$0xff]  }
  0xb4   :  { %2799 = vmatprep.subr.bf16.mxu1 %v3038_v29  ;;  %v3092_v28 = vld [vmem:[#allocation2 + $0x8c] ss:$48 sps:$4 sm:$0xff]   ;;  %v282_v29 = vrot.slane %v3087_v25, %v3195_v37 }
  0xb6   :  { %2778 = vmatpush3.bf16.msra.mxu0 %v3039_v30  ;;  %v296_v30 = vrot.slane %v3089_v26, %v3195_v37 }
  0xb7   :  { %2800 = vmatpush3.bf16.msra.mxu1 %v3040_v31  ;;  %2779 = vmatprep.subr.bf16.mxu0 %v3041_v32  ;;  %v289_v31 = vrot.slane %v3091_v27, %v3195_v37  ;;  %v303_v32 = vrot.slane %v3092_v28, %v3195_v37  ;;  %v2398_v37 = vld [vmem:[%s3229_s2] ss:$0 sm:$0xff] }
  0xb8   :  { %2801 = vmatprep.subr.bf16.mxu1 %v3042_v33  ;;  %v305_v33 = vcombine.high %v282_v29, %v296_v30 }
  0xba   :  { %2780 = vmatpush3.bf16.msra.mxu0 %v3043_v34  ;;  %v307_v34 = vcombine.high %v289_v31, %v303_v32 }
  0xbb   :  { %2802 = vmatpush3.bf16.msra.mxu1 %v3044_v35  ;;  %2781 = vmatprep.subr.bf16.mxu0 %v3045_v36  ;;  %v304_v35 = vcombine.low %v282_v29, %v296_v30  ;;  %v306_v36 = vcombine.low %v289_v31, %v303_v32 }
  0xbc   :  { %2803 = vmatprep.subr.bf16.mxu1 %v3046_v38  ;;  %v353_v38 = vpack.c.bf16 %v305_v33, %v305_v33 }
  0xbd   :  { %v354_v41 = vpack.c.bf16 %v306_v36, %v306_v36 }
  0xbe   :  { %2782 = vmatpush3.bf16.msra.mxu0 %v3047_v39  ;;  %v355_v39 = vpack.c.bf16 %v307_v34, %v307_v34 }
  0xbf   :  { %2804 = vmatpush3.bf16.msra.mxu1 %v3048_v40  ;;  %2811 = vmatprep.subr.bf16.mxu0 %v3055_v48  ;;  %v352_v40 = vpack.c.bf16 %v304_v35, %v304_v35 }
  0xc0   :  { %2833 = vmatprep.subr.bf16.mxu1 %v3056_v50 }
  0xc1   :  { %2252 = vmatmul.mubr.bf16.vlgmr.msra.gmra.mxu0 %v348_v58 }
  0xc2   :  { %2292 = vmatmul.mubr.bf16.vlgmr.msra.gmra.mxu1 %v350_v61  ;;  %2812 = vmatpush3.bf16.msra.mxu0 %v3057_v53 }
  0xc3   :  { %2834 = vmatpush3.bf16.msra.mxu1 %v3058_v56  ;;  %2813 = vmatprep.subr.bf16.mxu0 %v3059_v59 }
  0xc4   :  { %2835 = vmatprep.subr.bf16.mxu1 %v3060_v62  ;;  %2331 = vmatprep.mubr.bf16.mxu0 %v353_v38 }
  0xc5   :  { %2371 = vmatprep.mubr.bf16.mxu1 %v355_v39 }
  0xc6   :  { %2814 = vmatpush3.bf16.msra.mxu0 %v3061_v63 }
  0xc7   :  { %2836 = vmatpush3.bf16.msra.mxu1 %v3062_v0  ;;  %2815 = vmatprep.subr.bf16.mxu0 %v3063_v1 }
  0xc8   :  { %2837 = vmatprep.subr.bf16.mxu1 %v3064_v2 }
  0xca   :  { %2816 = vmatpush3.bf16.msra.mxu0 %v3065_v3 }
  0xcb   :  { %2838 = vmatpush3.bf16.msra.mxu1 %v3066_v4  ;;  %2817 = vmatprep.subr.bf16.mxu0 %v3067_v5 }
  0xcc   :  { %2839 = vmatprep.subr.bf16.mxu1 %v3068_v6 }
  0xce   :  { %2818 = vmatpush3.bf16.msra.mxu0 %v3069_v7 }
  0xcf   :  { %2840 = vmatpush3.bf16.msra.mxu1 %v3070_v8  ;;  %2819 = vmatprep.subr.bf16.mxu0 %v3071_v9 }
  0xd0   :  { %2841 = vmatprep.subr.bf16.mxu1 %v3072_v10 }
  0xd2   :  { %2820 = vmatpush3.bf16.msra.mxu0 %v3073_v11 }
  0xd3   :  { %2842 = vmatpush3.bf16.msra.mxu1 %v3074_v12  ;;  %2821 = vmatprep.subr.bf16.mxu0 %v3075_v13 }
  0xd4   :  { %2843 = vmatprep.subr.bf16.mxu1 %v3076_v14 }
  0xd6   :  { %2822 = vmatpush3.bf16.msra.mxu0 %v3077_v15 }
  0xd7   :  { %2844 = vmatpush3.bf16.msra.mxu1 %v3078_v16  ;;  %2823 = vmatprep.subr.bf16.mxu0 %v3079_v17 }
  0xd8   :  { %2845 = vmatprep.subr.bf16.mxu1 %v3080_v18 }
  0xda   :  { %2824 = vmatpush3.bf16.msra.mxu0 %v3081_v19 }
  0xdb   :  { %2846 = vmatpush3.bf16.msra.mxu1 %v3082_v20  ;;  %2825 = vmatprep.subr.bf16.mxu0 %v3083_v21 }
  0xdc   :  { %2847 = vmatprep.subr.bf16.mxu1 %v3084_v22 }
  0xde   :  { %2826 = vmatpush3.bf16.msra.mxu0 %v3085_v23 }
  0xdf   :  { %2848 = vmatpush3.bf16.msra.mxu1 %v3086_v24 }
  0xe1   :  { %2332 = vmatmul.mubr.bf16.vlgmr.msra.gmra.mxu0 %v352_v40 }
  0xe2   :  { %2372 = vmatmul.mubr.bf16.vlgmr.msra.gmra.mxu1 %v354_v41 }
 0x101   :  { %v2607_v42 = vpop.f32.mrf.mxu0 }
 0x102   :  { %v2629_v43 = vpop.f32.mrf.mxu1 }
 0x103   :  { %v2608_v44 = vpop.f32.mrf.mxu0 }
 0x104   :  { %v2609_v45 = vadd.f32 %v2608_v44, %v2607_v42  ;;  %v2630_v46 = vpop.f32.mrf.mxu1 }
 0x105   :  { %v2631_v47 = vadd.f32 %v2630_v46, %v2629_v43  ;;  %v2610_v48 = vpop.f32.mrf.mxu0 }
 0x106   :  { %v1934_v49 = vadd.f32 %v2609_v45, %v2398_v37  ;;  %v2632_v50 = vpop.f32.mrf.mxu1 }
 0x107   :  { %v2611_v51 = vpop.f32.mrf.mxu0 }
 0x108   :  { %v1974_v52 = vadd.f32 %v2631_v47, %v1934_v49  ;;  %v2633_v53 = vpop.f32.mrf.mxu1 }
 0x121   :  { %v2651_v54 = vpop.f32.mrf.mxu0 }
 0x122   :  { %v2673_v55 = vpop.f32.mrf.mxu1 }
 0x123   :  { %v2652_v56 = vpop.f32.mrf.mxu0 }
 0x124   :  { %v2653_v57 = vadd.f32 %v2652_v56, %v2651_v54  ;;  %v2674_v58 = vpop.f32.mrf.mxu1 }
 0x125   :  { %v2675_v59 = vadd.f32 %v2674_v58, %v2673_v55  ;;  %v2654_v60 = vpop.f32.mrf.mxu0 }
 0x126   :  { %v2014_v61 = vadd.f32 %v2653_v57, %v1974_v52  ;;  %v2676_v62 = vpop.f32.mrf.mxu1 }
 0x127   :  { %v2655_v63 = vpop.f32.mrf.mxu0 }
 0x128   :  { %v2054_v0 = vadd.f32 %v2675_v59, %v2014_v61  ;;  %v2677_v1 = vpop.f32.mrf.mxu1 }
 0x141   :  { %v2695_v2 = vpop.f32.mrf.mxu0 }
 0x142   :  { %v2717_v3 = vpop.f32.mrf.mxu1 }
 0x143   :  { %v2696_v4 = vpop.f32.mrf.mxu0 }
 0x144   :  { %v2718_v5 = vpop.f32.mrf.mxu1  ;;  %v2697_v6 = vadd.f32 %v2696_v4, %v2695_v2 }
 0x145   :  { %v2719_v7 = vadd.f32 %v2718_v5, %v2717_v3  ;;  %v2698_v8 = vpop.f32.mrf.mxu0 }
 0x146   :  { %v2720_v9 = vpop.f32.mrf.mxu1  ;;  %v2094_v10 = vadd.f32 %v2697_v6, %v2054_v0 }
 0x147   :  { %v2699_v11 = vpop.f32.mrf.mxu0 }
 0x148   :  { %v2721_v12 = vpop.f32.mrf.mxu1  ;;  %v2134_v13 = vadd.f32 %v2719_v7, %v2094_v10 }
 0x161   :  { %v2739_v14 = vpop.f32.mrf.mxu0 }
 0x162   :  { %v2761_v15 = vpop.f32.mrf.mxu1 }
 0x163   :  { %v2740_v16 = vpop.f32.mrf.mxu0 }
 0x164   :  { %v2741_v17 = vadd.f32 %v2740_v16, %v2739_v14  ;;  %v2762_v18 = vpop.f32.mrf.mxu1 }
 0x165   :  { %v2763_v19 = vadd.f32 %v2762_v18, %v2761_v15  ;;  %v2742_v20 = vpop.f32.mrf.mxu0 }
 0x166   :  { %v2174_v21 = vadd.f32 %v2741_v17, %v2134_v13  ;;  %v2764_v22 = vpop.f32.mrf.mxu1 }
 0x167   :  { %v2743_v23 = vpop.f32.mrf.mxu0 }
 0x168   :  { %v2214_v24 = vadd.f32 %v2763_v19, %v2174_v21  ;;  %v2765_v25 = vpop.f32.mrf.mxu1 }
 0x181   :  { %v2783_v26 = vpop.f32.mrf.mxu0 }
 0x182   :  { %v2805_v27 = vpop.f32.mrf.mxu1 }
 0x183   :  { %v2784_v28 = vpop.f32.mrf.mxu0 }
 0x184   :  { %v2806_v29 = vpop.f32.mrf.mxu1  ;;  %v2785_v34 = vadd.f32 %v2784_v28, %v2783_v26 }
 0x185   :  { %v2786_v30 = vpop.f32.mrf.mxu0  ;;  %v2807_v36 = vadd.f32 %v2806_v29, %v2805_v27 }
 0x186   :  { %v2808_v31 = vpop.f32.mrf.mxu1  ;;  %v2254_v35 = vadd.f32 %v2785_v34, %v2214_v24 }
 0x187   :  { %v2787_v32 = vpop.f32.mrf.mxu0 }
 0x188   :  { %v2809_v33 = vpop.f32.mrf.mxu1  ;;  %v2294_v42 = vadd.f32 %v2807_v36, %v2254_v35 }
 0x1a1   :  { %v2827_v38 = vpop.f32.mrf.mxu0 }
 0x1a2   :  { %v2849_v39 = vpop.f32.mrf.mxu1 }
 0x1a3   :  { %v2828_v40 = vpop.f32.mrf.mxu0 }
 0x1a4   :  { %v2850_v41 = vpop.f32.mrf.mxu1  ;;  %v2829_v43 = vadd.f32 %v2828_v40, %v2827_v38 }
 0x1a5   :  { %v2830_v37 = vpop.f32.mrf.mxu0  ;;  %v2851_v46 = vadd.f32 %v2850_v41, %v2849_v39 }
 0x1a6   :  { %v2852_v44 = vpop.f32.mrf.mxu1  ;;  %v2334_v45 = vadd.f32 %v2829_v43, %v2294_v42 }
 0x1a7   :  { %v2831_v47 = vpop.f32.mrf.mxu0 }
 0x1a8   :  { %v2853_v48 = vpop.f32.mrf.mxu1  ;;  %v2374_v49 = vadd.f32 %v2851_v46, %v2334_v45 }
 0x1aa   :  { %2379 = vst [vmem:[#allocation7] sm:$0xff] %v2374_v49 }
 0x1ab   :  { %2384 = vsyncadd [#allocation4], 96  ;;  %s3166_s2 = smov [#allocation7]  }
 0x1ac   :  { %s2385_s27 = sshll.u32 %s3166_s2, 4  ;;  %s2386_s27 = int_to_ptr.vmem [resolvable:$true] %s2385_s27 }
 0x1ad   :  { %s3133_s28 = scalar_lea.vmem %s2386_s27, 32  ;;  %s3137_s29 = scalar_lea.vmem %s2386_s27, 128 }
 0x1ae   :  { %p3134_p10 = scmp.ne.s32.totalorder %s2386_s27, %s3133_s28  ;;  %p3138_p11 = scmp.lt.s32.totalorder %s2386_s27, %s2386_s27 }
 0x1af   :  { %p3139_p12 = scmp.lt.s32.totalorder %s3137_s29, %s3133_s28 }
 0x1b1   :  { %p3140_p13 = por %p3139_p12, %p3138_p11 }
 0x1b3   :  { %p3141_p0 = pnand %p3140_p13, %p3134_p10 }
 0x1b5   :  { %3144 = shalt.err (!%p3141_p0)
}
 0x1b6   :  { %s3167_s30 = smov 32   ;;  %s3168_s4 = smov 2  }
 0x1b7   :  { %2391 = dma.vmem_to_hbm [thread:$0]  %s2386_s27, 32, %s3230_s3, [#allocation4], %s3167_s30, %s3167_s30, %s3168_s4  }
 0x1b8   :  { %3157 = dma.done.wait [#allocation4], 128  }
 0x1b9   :  { %3158 = vsyncadd [#allocation4], 4294967168 }
 0x1ba   :  { %2395 = vsyncpa [#allocation3], 1 }
 0x1bb   :  { %2396 = vsyncpa [#allocation6], 1 }
 0x1bc   :  { %2397 = vsyncpa [#allocation4], 1 }

</bundles_post_ra>
